<compile_context>
chip_gen: v7x
topology: tpu7x:2x2x1
jax: 0.10.0
libtpu: 0.0.40
codegen_flags: <defaults>
</compile_context>

<pallas_src>
import jax
import jax.numpy as jnp
from jax.experimental import pallas as pl
from jax.experimental.pallas import tpu as pltpu


def _proj_kernel(emb_ref, w_ref, b_ref, out_ref):
    # emb_ref: [M, C]      resident across the N grid (f32; cast on-chip)
    # w_ref:   [1, C, TN]  one contiguous pre-blocked weight tile (bf16 stream)
    # b_ref:   [1, TN]     f32 bias tile
    # out_ref: [M, TN]     f32, lane-dense full-width stores
    x = emb_ref[...].astype(w_ref.dtype)
    acc = jnp.dot(x, w_ref[0], preferred_element_type=jnp.float32)
    out_ref[...] = (acc + b_ref[...]).astype(out_ref.dtype)


def _choose_tile_n(N, C, stream_itemsize, *, max_tile_n=2048,
                   weight_tile_budget_bytes=16 << 20):
    """Largest multiple-of-128 divisor of N, capped so the double-buffered
    weight tile (2 * C * tile_n * itemsize) stays under budget (v7x-safe).
    Falls back to the full N as a single tile (block == full array dim) when
    N has no multiple-of-128 divisor -- avoids the old hard assert."""
    cap = weight_tile_budget_bytes // (2 * C * stream_itemsize)
    cap = max(128, min(max_tile_n, cap))
    cap = (cap // 128) * 128
    best = None
    t = 128
    while t <= min(N, cap):
        if N % t == 0:
            best = t
        t += 128
    return best if best is not None else N


def text_encoder_proj(embedding_2d, weight_blocked, bias):
    """embedding_2d: [M, C] f32, weight_blocked: [T, C, TN] (stream dtype),
    bias: [N] f32  ->  [M, N] f32 where N = T * TN."""
    M, C = embedding_2d.shape
    n_tiles, Cw, tile_n = weight_blocked.shape
    assert Cw == C, (Cw, C)
    N = n_tiles * tile_n
    assert bias.shape == (N,), (bias.shape, N)
    bias2d = bias.reshape(1, N)

    wbytes = jnp.dtype(weight_blocked.dtype).itemsize
    ebytes = jnp.dtype(embedding_2d.dtype).itemsize

    # Double-buffered tiles: resident emb, streamed weight, bias, output.
    vmem_needed = (2 * M * C * ebytes
                   + 2 * C * tile_n * wbytes
                   + 2 * tile_n * 4
                   + 2 * M * tile_n * 4)
    # Explicit limit with 2x headroom, floored at 16 MiB, capped below v7x's
    # 64 MiB physical VMEM.
    vmem_limit = int(min(max(2 * vmem_needed, 16 << 20), 48 << 20))

    cost = pl.CostEstimate(
        flops=2 * M * C * N,
        transcendentals=0,
        bytes_accessed=M * C * ebytes + C * N * wbytes + N * 4 + M * N * 4,
    )

    return pl.pallas_call(
        _proj_kernel,
        out_shape=jax.ShapeDtypeStruct((M, N), jnp.float32),
        grid_spec=pltpu.PrefetchScalarGridSpec(
            num_scalar_prefetch=0,
            grid=(n_tiles,),
            in_specs=[
                pl.BlockSpec((M, C), lambda j: (0, 0)),             # resident emb
                pl.BlockSpec((1, C, tile_n), lambda j: (j, 0, 0)),  # contiguous W tile
                pl.BlockSpec((1, tile_n), lambda j: (0, j)),        # bias tile
            ],
            out_specs=pl.BlockSpec((M, tile_n), lambda j: (0, j)),
        ),
        compiler_params=pltpu.CompilerParams(
            dimension_semantics=("parallel",),   # v7x: split N tiles over 2 TCs
            vmem_limit_bytes=vmem_limit,
        ),
        cost_estimate=cost,
    )(embedding_2d, weight_blocked, bias2d)


class TextEncoderPallas:
    """JAX/Pallas port of Text_Encoder (projection head only)."""

    def __init__(self, num_texts: int, seq_len: int, emb_dim: int, key,
                 *, stream_dtype=jnp.bfloat16, max_tile_n: int = 2048):
        self.num_texts = num_texts
        self.seq_len = seq_len
        self.emb_dim = emb_dim
        self.stream_dtype = stream_dtype

        k_w, k_b = jax.random.split(key)
        out_dim = emb_dim * seq_len
        # nn.init.normal_(weight, mean=0.0, std=1.0); torch weight is [out, in]
        w = jax.random.normal(k_w, (out_dim, emb_dim), dtype=jnp.float32)
        # default nn.Linear bias init: U(-1/sqrt(fan_in), 1/sqrt(fan_in))
        bound = 1.0 / (emb_dim ** 0.5)
        b = jax.random.uniform(k_b, (out_dim,), dtype=jnp.float32,
                               minval=-bound, maxval=bound)

        self.weight_t = w.T                 # [C, N] f32 (kept for reference)
        self.bias = b                       # [N] f32

        itemsize = jnp.dtype(stream_dtype).itemsize
        self.tile_n = _choose_tile_n(out_dim, emb_dim, itemsize,
                                     max_tile_n=max_tile_n)
        n_tiles = out_dim // self.tile_n
        # Pre-block to [n_tiles, C, tile_n] so each grid step DMAs one long
        # contiguous slab; stream as bf16 (half the HBM bytes of the hot path).
        self.weight_blocked = (
            self.weight_t.reshape(emb_dim, n_tiles, self.tile_n)
            .transpose(1, 0, 2)
            .astype(stream_dtype)
        )

    def __call__(self, embedding):
        # embedding: any shape (..., C) with prod(leading) divisible by num_texts
        C = embedding.shape[-1]
        emb2d = embedding.reshape(-1, C).astype(jnp.float32)   # [M, C]
        out2d = text_encoder_proj(emb2d, self.weight_blocked, self.bias)
        return out2d.reshape(-1, self.num_texts, self.seq_len, C)


def _reference(embedding, weight_t, bias, num_texts, seq_len, stream_dtype):
    """Pure-JAX reference following the same bf16-stream / f32-accumulate path."""
    C = embedding.shape[-1]
    emb = embedding.reshape(-1, C).astype(stream_dtype).astype(jnp.float32)
    w = weight_t.astype(stream_dtype).astype(jnp.float32)
    out = emb @ w + bias
    return out.reshape(-1, num_texts, seq_len, C)


if __name__ == "__main__":
    key = jax.random.PRNGKey(0)
    k_emb, k_params = jax.random.split(key)

    batch = 2
    num_texts = 4
    seq_len = 8
    emb_dim = 32          # C  -> N = seq_len * emb_dim = 256

    # Synthetic output of backbone.encode(text): [batch * num_texts, emb_dim]
    embedding = jax.random.normal(
        k_emb, (batch * num_texts, emb_dim), dtype=jnp.float32)

    model = TextEncoderPallas(num_texts, seq_len, emb_dim, k_params)
    # For this small N (=256) the tile selector picks tile_n = 256 -> a single
    # grid step with everything resident (no per-step pipeline overhead).

    out = model(embedding)
    out = jax.block_until_ready(out)

    assert out.shape == (batch, num_texts, seq_len, emb_dim), out.shape

    ref = _reference(embedding, model.weight_t, model.bias,
                     num_texts, seq_len, model.stream_dtype)
    assert jnp.allclose(out, ref, atol=1e-3, rtol=1e-3), "mismatch vs reference"

    print("KERNEL_OK")
</pallas_src>

<mosaic_0001>
module attributes {stable_mosaic.version = 11 : i64} {
  func.func @_proj_kernel(%arg0: i32, %arg1: memref<8x32xf32, #tpu.memory_space<vmem>>, %arg2: memref<1x32x256xbf16, #tpu.memory_space<vmem>>, %arg3: memref<1x256xf32, #tpu.memory_space<vmem>>, %arg4: memref<8x256xf32, #tpu.memory_space<vmem>>) attributes {dimension_semantics = [#tpu.dimension_semantics<parallel>], iteration_bounds = array<i64: 1>, scalar_prefetch = 0 : i64, scratch_operands = 0 : i64, tpu.core_type = #tpu.core_type<tc>, window_params = [{pipeline_mode = #tpu.pipeline_mode<synchronous>, transform_indices = @transform_0, window_bounds = array<i64: 8, 32>}, {transform_indices = @transform_1, window_bounds = array<i64: 1, 32, 256>}, {transform_indices = @transform_2, window_bounds = array<i64: 1, 256>}, {transform_indices = @transform_3, window_bounds = array<i64: 8, 256>}]} {
    %c0 = arith.constant 0 : index
    %c0_0 = arith.constant 0 : index
    %0 = vector.load %arg1[%c0, %c0_0] : memref<8x32xf32, #tpu.memory_space<vmem>>, vector<8x32xf32>
    %1 = arith.truncf %0 : vector<8x32xf32> to vector<8x32xbf16>
    %c0_1 = arith.constant 0 : index
    %c0_2 = arith.constant 0 : index
    %c0_3 = arith.constant 0 : index
    %2 = vector.load %arg2[%c0_1, %c0_2, %c0_3] : memref<1x32x256xbf16, #tpu.memory_space<vmem>>, vector<1x32x256xbf16>
    %3 = vector.shape_cast %2 : vector<1x32x256xbf16> to vector<32x256xbf16>
    %cst = arith.constant dense<0.000000e+00> : vector<8x256xf32>
    %4 = tpu.matmul %1, %3, %cst {dimension_numbers = #tpu.dot_dimension_numbers<[1], [0], [0], [1], [0, 0, 1, 1], [], []>} : vector<8x32xbf16>, vector<32x256xbf16>, vector<8x256xf32> -> vector<8x256xf32>
    %c0_4 = arith.constant 0 : index
    %c0_5 = arith.constant 0 : index
    %5 = vector.load %arg3[%c0_4, %c0_5] : memref<1x256xf32, #tpu.memory_space<vmem>>, vector<1x256xf32>
    %6 = vector.broadcast %5 : vector<1x256xf32> to vector<8x256xf32>
    %7 = arith.addf %4, %6 : vector<8x256xf32>
    %c0_6 = arith.constant 0 : index
    %c0_7 = arith.constant 0 : index
    %8 = vector.load %arg4[%c0_6, %c0_7] : memref<8x256xf32, #tpu.memory_space<vmem>>, vector<8x256xf32>
    tpu.vector_store %arg4[%c0_6, %c0_7], %7 {strides = array<i32>} : memref<8x256xf32, #tpu.memory_space<vmem>>, vector<8x256xf32>,
    return
  }
  func.func @transform_0(%arg0: i32) -> (i32, i32) {
    %c0_i32 = arith.constant 0 : i32
    %c0_i32_0 = arith.constant 0 : i32
    %c0_i32_1 = arith.constant 0 : i32
    return %c0_i32, %c0_i32_0 : i32, i32
  }
  func.func @transform_1(%arg0: i32) -> (i32, i32, i32) {
    %c0_i32 = arith.constant 0 : i32
    %c0_i32_0 = arith.constant 0 : i32
    %c0_i32_1 = arith.constant 0 : i32
    return %arg0, %c0_i32, %c0_i32_0 : i32, i32, i32
  }
  func.func @transform_2(%arg0: i32) -> (i32, i32) {
    %c0_i32 = arith.constant 0 : i32
    %c0_i32_0 = arith.constant 0 : i32
    return %c0_i32, %arg0 : i32, i32
  }
  func.func @transform_3(%arg0: i32) -> (i32, i32) {
    %c0_i32 = arith.constant 0 : i32
    %c0_i32_0 = arith.constant 0 : i32
    return %c0_i32, %arg0 : i32, i32
  }
}

</mosaic_0001>

<bundles_post_ra>
// kernel: tpu_custom_call.1
= control target key start
LH: loop header
LB: loop body
LE: loop exit
PB: predicated region body
PF: predicated region fallthrough
CT: control target
= control target key end

     0   :  { %8 = vsyncpa [#allocation3], 0  ;;  %s304_s0 = inlined_call_operand.hbm [shape: f32[8,32], index: 0, kind: input, shape index: {}]   ;;  %s305_s1 = inlined_call_operand.hbm [shape: bf16[1,32,256], index: 1, kind: input, shape index: {}]   ;;  %s306_s2 = inlined_call_operand.vmem [shape: f32[1,256], index: 2, kind: input, shape index: {}]   ;;  %s307_s3 = inlined_call_operand.hbm [shape: f32[8,256], index: 3, kind: output, shape index: {}]  }
   0x1   :  { %9 = vsyncpa [#allocation6], 0 }
   0x2   :  { %10 = vsyncpa [#allocation4], 0  ;;  %s232_s12 = smov [#allocation2]   ;;  %s233_s14 = smov [#allocation5]  }
   0x3   :  { %s17_s13 = sshll.u32 %s232_s12, 4  ;;  %s26_s15 = sshll.u32 %s233_s14, 4  ;;  %s18_s13 = int_to_ptr.vmem [resolvable:$true] %s17_s13  ;;  %s258_s15 = int_to_ptr.vmem [resolvable:$true] %s26_s15 }
   0x4   :  { %s160_s18 = scalar_lea.hbm %s304_s0, 128 }
   0x5   :  { %p161_p0 = scmp.ne.s32.totalorder %s304_s0, %s160_s18  ;;  %p164_p1 = scmp.lt.u32.totalorder %s160_s18, %s304_s0 }
   0x7   :  { %p166_p2 = pnand %p164_p1, %p161_p0 }
   0x9   :  { %169 = shalt.err (!%p166_p2)
}
   0xa   :  { %s170_s23 = scalar_lea.vmem %s18_s13, 128  ;;  %p175_p4 = scmp.lt.s32.totalorder %s18_s13, %s18_s13 }
   0xb   :  { %p171_p3 = scmp.ne.s32.totalorder %s18_s13, %s170_s23  ;;  %p176_p5 = scmp.lt.s32.totalorder %s170_s23, %s170_s23 }
   0xd   :  { %p177_p6 = por %p176_p5, %p175_p4 }
   0xf   :  { %p178_p7 = pnand %p177_p6, %p171_p3 }
  0x11   :  { %181 = shalt.err (!%p178_p7)
}
  0x12   :  { %20 = dma.hbm_to_vmem [thread:$0]  %s304_s0, 128, %s18_s13, [#allocation3]  }
  0x13   :  { %s182_s28 = scalar_lea.hbm %s305_s1, 512 }
  0x14   :  { %p183_p8 = scmp.ne.s32.totalorder %s305_s1, %s182_s28  ;;  %p186_p9 = scmp.lt.u32.totalorder %s182_s28, %s305_s1 }
  0x16   :  { %p188_p10 = pnand %p186_p9, %p183_p8 }
  0x18   :  { %191 = shalt.err (!%p188_p10)
}
  0x19   :  { %s192_s6 = scalar_lea.vmem %s258_s15, 512  ;;  %p197_p12 = scmp.lt.s32.totalorder %s258_s15, %s258_s15 }
  0x1a   :  { %p193_p11 = scmp.ne.s32.totalorder %s258_s15, %s192_s6  ;;  %p198_p13 = scmp.lt.s32.totalorder %s192_s6, %s192_s6 }
  0x1c   :  { %p199_p0 = por %p198_p13, %p197_p12 }
  0x1e   :  { %p200_p1 = pnand %p199_p0, %p193_p11 }
  0x20   :  { %203 = shalt.err (!%p200_p1)
}
  0x21   :  { %s234_s0 = smov 128   ;;  %s235_s7 = smov 8  }
  0x22   :  { %32 = dma.hbm_to_vmem [thread:$0]  %s305_s1, 512, %s258_s15, [#allocation6], %s234_s0, %s234_s0, %s235_s7  }
  0x23   :  { %226 = dma.done.wait [#allocation3], 128  }
  0x24   :  { %227 = vsyncadd [#allocation3], 4294967168 }
  0x25   :  { %228 = dma.done.wait [#allocation6], 512  }
  0x26   :  { %229 = vsyncadd [#allocation6], 4294966784  ;;  %v236_v0 = vmov 0   ;;  %v154_v1 = vld [vmem:[#allocation5 + $0x4] ss:$8 sps:$4 sm:$0xff]   ;;  %v42_v5 = vld [vmem:[#allocation2] sm:$0xff]  ;;  %v50_v7 = vlaneseq }
  0x27   :  { %116 = vmatprep.mubr.bf16.mxu0 %v236_v0  ;;  %v156_v2 = vld [vmem:[#allocation5] ss:$8 sps:$4 sm:$0xff]   ;;  %84 = vmatprep.subr.bf16.mxu0 %v154_v1  ;;  %v157_v3 = vld [vmem:[#allocation5 + $0x14] ss:$8 sps:$4 sm:$0xff]   ;;  %v159_v4 = vld [vmem:[#allocation5 + $0x10] ss:$8 sps:$4 sm:$0xff]   ;;  %v43_v6 = vpack.c.bf16 %v42_v5, %v42_v5 }
  0x28   :  { %85 = vmatpush1.bf16.msra.mxu0 %v156_v2  ;;  %vm80_vm0 = vcmask 261120   ;;  %v51_v8 = vshrl.u32 %v50_v7, 7  ;;  %v48_v10 = vld [vmem:[%s306_s2] sm:$0x3]  ;;  %s237_s11 = smov [#allocation7]  }
  0x29   :  { %86 = vmatprep.subr.bf16.mxu0 %v157_v3  ;;  %s133_s12 = sshll.u32 %s237_s11, 4  ;;  %s134_s12 = int_to_ptr.vmem [resolvable:$true] %s133_s12 }
  0x2a   :  { %v52_v9 = vsub.s32 0, %v51_v8  ;;  %v56_v11 = vsub.s32 1, %v51_v8  ;;  %s204_s13 = scalar_lea.vmem %s134_s12, 256  ;;  %p209_p3 = scmp.lt.s32.totalorder %s134_s12, %s134_s12 }
  0x2b   :  { %p205_p2 = scmp.ne.s32.totalorder %s134_s12, %s204_s13  ;;  %p210_p4 = scmp.lt.s32.totalorder %s204_s13, %s204_s13 }
  0x2c   :  { %87 = vmatpush1.bf16.msra.mxu0 %v159_v4  ;;  %v53_v12 = vrot.slane %v48_v10, %v52_v9  ;;  %v57_v13 = vrot.slane %v48_v10, %v56_v11 }
  0x2d   :  { %p211_p5 = por %p210_p4, %p209_p3 }
  0x2f   :  { %147 = vmatmul.mubr.msk.bf16.vlgmr.msra.gmra.mrb[0].mxu0 %vm80_vm0, %v43_v6  ;;  %p212_p6 = pnand %p211_p5, %p205_p2 }
 0x102   :  { %v118_v14 = vpop.f32.mrb[0].mxu0 }
 0x103   :  { %v119_v15 = vadd.f32 %v118_v14, %v53_v12  ;;  %v120_v16 = vpop.f32.mrb[1].mxu0 }
 0x104   :  { %v121_v17 = vadd.f32 %v120_v16, %v57_v13  ;;  %v122_v18 = vpop.f32.mrb[2].mxu0 }
 0x105   :  { %125 = vst [vmem:[#allocation7] sm:$0xff] %v119_v15  ;;  %v123_v19 = vpop.f32.mrb[3].mxu0 }
 0x106   :  { %126 = vst [vmem:[#allocation7 + $0x8] sm:$0xff] %v121_v17 }
 0x107   :  { %215 = shalt.err (!%p212_p6)
}
 0x108   :  { %s216_s15 = scalar_lea.hbm %s307_s3, 256 }
 0x109   :  { %p217_p7 = scmp.ne.s32.totalorder %s307_s3, %s216_s15  ;;  %p220_p8 = scmp.lt.u32.totalorder %s216_s15, %s307_s3 }
 0x10b   :  { %p222_p9 = pnand %p220_p8, %p217_p7 }
 0x10d   :  { %225 = shalt.err (!%p222_p9)
}
 0x10e   :  { %136 = dma.vmem_to_hbm [thread:$0]  %s134_s12, 256, %s307_s3, [#allocation4]  }
 0x10f   :  { %230 = dma.done.wait [#allocation4], 256  }
 0x110   :  { %231 = vsyncadd [#allocation4], 4294967040 }
 0x111   :  { %140 = vsyncpa [#allocation3], 1 }
 0x112   :  { %141 = vsyncpa [#allocation6], 1 }
 0x113   :  { %142 = vsyncpa [#allocation4], 1 }

</bundles_post_ra>
